<compile_context>
chip_gen: v7x
topology: tpu7x:2x2x1
jax: 0.10.0
libtpu: 0.0.40
codegen_flags: <defaults>
</compile_context>

<pallas_src>
import functools

import jax
import jax.numpy as jnp
from jax.experimental import pallas as pl
from jax.experimental.pallas import tpu as pltpu


def _round_up(n: int, m: int) -> int:
    return ((n + m - 1) // m) * m


# ---------------------------------------------------------------------------
# Pass 1: MLP (3 linears, 2 ReLUs) + per-tile partial BN statistics.
# ---------------------------------------------------------------------------
def _mlp_stats_kernel(x_ref, w1_ref, w2_ref, w3_ref, b12_ref, y_ref, ps_ref,
                      *, n_valid, tm, padded_rows):
    """Per batch-tile:
       x_ref  [tm, Zp] (mxu dtype)   b12_ref [2, Hp] f32 (rows: b1, b2)
       w1_ref [Zp, Hp] (mxu dtype)   y_ref   [tm, Xp] f32   (pre-BN activations)
       w2_ref [Hp, Hp] (mxu dtype)   ps_ref  [1, 2, Xp] f32 (partial sum / sumsq)
       w3_ref [Hp, Xp] (mxu dtype)
    """
    mxu_dtype = w1_ref.dtype
    b12 = b12_ref[...]

    h1 = jnp.dot(x_ref[...], w1_ref[...], preferred_element_type=jnp.float32)
    h1 = jnp.maximum(h1 + b12[0:1, :], 0.0)

    h2 = jnp.dot(h1.astype(mxu_dtype), w2_ref[...], preferred_element_type=jnp.float32)
    h2 = jnp.maximum(h2 + b12[1:2, :], 0.0)

    y = jnp.dot(h2.astype(mxu_dtype), w3_ref[...], preferred_element_type=jnp.float32)
    # NOTE: Linear-3 bias (b3) intentionally omitted — a per-column constant is
    # cancelled exactly by the BatchNorm mean subtraction (running stats, which
    # would see b3, are not emitted), so the final output is identical.
    y_ref[...] = y

    def stats(yv):
        s1 = jnp.sum(yv, axis=0, keepdims=True)        # (1, Xp)  sum
        s2 = jnp.sum(yv * y, axis=0, keepdims=True)     # (1, Xp)  sum of squares
        return jnp.concatenate([s1, s2], axis=0)        # (2, Xp)

    if padded_rows == 0:
        ps_ref[0] = stats(y)
    else:
        # Only the LAST tile contains zero-padded batch rows; mask only there.
        i = pl.program_id(0)
        last = pl.num_programs(0) - 1

        @pl.when(i != last)
        def _():
            ps_ref[0] = stats(y)

        @pl.when(i == last)
        def _():
            row = jax.lax.broadcasted_iota(jnp.int32, y.shape, 0)
            valid_rows = n_valid - i * tm
            mask = (row < valid_rows).astype(jnp.float32)
            ps_ref[0] = stats(y * mask)


# ---------------------------------------------------------------------------
# Pass 2: fused BatchNorm affine + sigmoid (per batch tile).
#   sigmoid(gamma*(y-mean)*inv_std + beta) == 0.5*tanh(y*scale + shift) + 0.5
# ---------------------------------------------------------------------------
def _bn_sigmoid_kernel(y_ref, ss_ref, o_ref):
    ss = ss_ref[...]                                   # (2, Xp): [scale; shift]
    o_ref[...] = 0.5 * jnp.tanh(y_ref[...] * ss[0:1, :] + ss[1:2, :]) + 0.5


# ---------------------------------------------------------------------------
# Forward implementation (traced under jit; prepared params passed as args).
# ---------------------------------------------------------------------------
def _generator_fc_impl(x, w1_p, w2_p, w3_p, b12_p, gb_p, *, x_dim, mxu_dtype, tm):
    N, Z = x.shape
    Zp, Hp = w1_p.shape
    Xp = w3_p.shape[1]

    tm_ = tm if tm is not None else min(512, _round_up(N, 8))
    Np = _round_up(N, tm_)
    padded_rows = Np - N
    grid_m = Np // tm_

    x_p = x
    if (Np, Zp) != (N, Z):
        x_p = jnp.pad(x, ((0, Np - N), (0, Zp - Z)))
    x_p = x_p.astype(mxu_dtype)

    itemsize = jnp.dtype(mxu_dtype).itemsize

    # VMEM budget: resident weights + double-buffered x/y/stats tiles + h1/h2 temps.
    w_bytes = (Zp * Hp + Hp * Hp + Hp * Xp) * itemsize + 2 * Hp * 4
    pipe_bytes = 2 * (tm_ * Zp * itemsize + tm_ * Xp * 4 + 2 * Xp * 4)
    act_bytes = 2 * tm_ * Hp * 4 + tm_ * Hp * itemsize
    vmem_limit = max(min(w_bytes + pipe_bytes + act_bytes + (4 << 20), 56 << 20), 32 << 20)

    flops1 = 2 * Np * (Zp * Hp + Hp * Hp + Hp * Xp) + 6 * Np * Xp
    bytes1 = (Np * Zp * itemsize + (Zp * Hp + Hp * Hp + Hp * Xp) * itemsize
              + 2 * Hp * 4 + Np * Xp * 4 + grid_m * 2 * Xp * 4)

    kernel1 = functools.partial(
        _mlp_stats_kernel, n_valid=N, tm=tm_, padded_rows=padded_rows)

    y_p, ps = pl.pallas_call(
        kernel1,
        grid=(grid_m,),
        in_specs=[
            pl.BlockSpec((tm_, Zp), lambda i: (i, 0)),   # x tile streams
            pl.BlockSpec((Zp, Hp), lambda i: (0, 0)),    # weights resident
            pl.BlockSpec((Hp, Hp), lambda i: (0, 0)),
            pl.BlockSpec((Hp, Xp), lambda i: (0, 0)),
            pl.BlockSpec((2, Hp), lambda i: (0, 0)),
        ],
        out_specs=(
            pl.BlockSpec((tm_, Xp), lambda i: (i, 0)),
            pl.BlockSpec((1, 2, Xp), lambda i: (i, 0, 0)),
        ),
        out_shape=(
            jax.ShapeDtypeStruct((Np, Xp), jnp.float32),
            jax.ShapeDtypeStruct((grid_m, 2, Xp), jnp.float32),
        ),
        compiler_params=pltpu.CompilerParams(
            dimension_semantics=("parallel",),
            vmem_limit_bytes=vmem_limit,
        ),
        cost_estimate=pl.CostEstimate(
            flops=flops1, transcendentals=0, bytes_accessed=bytes1),
    )(x_p, w1_p, w2_p, w3_p, b12_p)

    # Reduce per-tile partials (tiny, Xp-wide) and fold BN + sigmoid prescale
    # into a single per-column scale/shift.
    sums = jnp.sum(ps, axis=0)                            # (2, Xp) f32
    mean = sums[0] * (1.0 / N)
    var = jnp.maximum(sums[1] * (1.0 / N) - mean * mean, 0.0)
    inv = gb_p[0] * jax.lax.rsqrt(var + 1e-5)             # gamma * inv_std
    scale = 0.5 * inv
    shift = 0.5 * (gb_p[1] - mean * inv)
    ss = jnp.stack([scale, shift], axis=0).astype(jnp.float32)   # (2, Xp)

    flops2 = 4 * Np * Xp
    bytes2 = 2 * Np * Xp * 4 + 2 * Xp * 4

    out_p = pl.pallas_call(
        _bn_sigmoid_kernel,
        grid=(grid_m,),
        in_specs=[
            pl.BlockSpec((tm_, Xp), lambda i: (i, 0)),
            pl.BlockSpec((2, Xp), lambda i: (0, 0)),
        ],
        out_specs=pl.BlockSpec((tm_, Xp), lambda i: (i, 0)),
        out_shape=jax.ShapeDtypeStruct((Np, Xp), jnp.float32),
        input_output_aliases={0: 0},                       # reuse y buffer for output
        compiler_params=pltpu.CompilerParams(
            dimension_semantics=("parallel",),
            vmem_limit_bytes=vmem_limit,
        ),
        cost_estimate=pl.CostEstimate(
            flops=flops2, transcendentals=Np * Xp, bytes_accessed=bytes2),
    )(y_p, ss)

    return out_p[:N, :x_dim]


# ---------------------------------------------------------------------------
# One-time parameter preparation (pad / cast / pack) + jitted forward factory.
# ---------------------------------------------------------------------------
def make_generator_fc(params, *, mxu_dtype=jnp.bfloat16, tm=None):
    w1, b1, w2, b2, w3, b3, gamma, beta = params
    Z, H = w1.shape
    X = w3.shape[1]
    Zp, Hp, Xp = _round_up(Z, 128), _round_up(H, 128), _round_up(X, 128)

    def pad2(a, r, c):
        return jnp.pad(a, ((0, r - a.shape[0]), (0, c - a.shape[1])))

    # Done ONCE here, not per forward call.
    w1_p = pad2(w1, Zp, Hp).astype(mxu_dtype)
    w2_p = pad2(w2, Hp, Hp).astype(mxu_dtype)
    w3_p = pad2(w3, Hp, Xp).astype(mxu_dtype)
    b12_p = jnp.concatenate([pad2(b1, 1, Hp), pad2(b2, 1, Hp)], axis=0).astype(jnp.float32)
    gb_p = jnp.concatenate([pad2(gamma, 1, Xp), pad2(beta, 1, Xp)], axis=0).astype(jnp.float32)
    # b3 intentionally not packed: it cancels under BN mean subtraction (see kernel note).

    fwd_impl = jax.jit(functools.partial(
        _generator_fc_impl, x_dim=X, mxu_dtype=mxu_dtype, tm=tm))

    def forward(x):
        return fwd_impl(x, w1_p, w2_p, w3_p, b12_p, gb_p)

    return forward


# ---------------------------------------------------------------------------
# Parameter init matching PyTorch initialize_weights + BatchNorm defaults.
# ---------------------------------------------------------------------------
def init_params(key, z_dim, h_dim, X_dim):
    k1, k2, k3 = jax.random.split(key, 3)
    w1 = 0.02 * jax.random.normal(k1, (z_dim, h_dim), jnp.float32)
    b1 = jnp.zeros((1, h_dim), jnp.float32)
    w2 = 0.02 * jax.random.normal(k2, (h_dim, h_dim), jnp.float32)
    b2 = jnp.zeros((1, h_dim), jnp.float32)
    w3 = 0.02 * jax.random.normal(k3, (h_dim, X_dim), jnp.float32)
    b3 = jnp.zeros((1, X_dim), jnp.float32)
    gamma = jnp.ones((1, X_dim), jnp.float32)
    beta = jnp.zeros((1, X_dim), jnp.float32)
    return w1, b1, w2, b2, w3, b3, gamma, beta


def reference_fc(x, w1, b1, w2, b2, w3, b3, gamma, beta):
    h1 = jnp.maximum(x @ w1 + b1, 0.0)
    h2 = jnp.maximum(h1 @ w2 + b2, 0.0)
    y = h2 @ w3 + b3
    mean = jnp.mean(y, axis=0, keepdims=True)
    var = jnp.mean((y - mean) ** 2, axis=0, keepdims=True)
    z = (y - mean) / jnp.sqrt(var + 1e-5) * gamma + beta
    return jax.nn.sigmoid(z)


if __name__ == "__main__":
    z_dim, h_dim, X_dim = 8, 32, 16
    batch = 8

    key = jax.random.PRNGKey(0)
    k_in, k_in2, k_params = jax.random.split(key, 3)

    x = jax.random.normal(k_in, (batch, z_dim), jnp.float32)
    params = init_params(k_params, z_dim, h_dim, X_dim)
    ref = reference_fc(x, *params)

    # f32 MXU path: tight numerical check against the pure-JAX reference.
    fwd_f32 = make_generator_fc(params, mxu_dtype=jnp.float32)
    out = jax.block_until_ready(fwd_f32(x))
    assert out.shape == (batch, X_dim)
    assert jnp.allclose(out, ref, atol=1e-5, rtol=1e-5)

    # Non-multiple-of-8 batch: exercises the padded-row (last-tile mask) path.
    x2 = jax.random.normal(k_in2, (10, z_dim), jnp.float32)
    ref2 = reference_fc(x2, *params)
    out2 = jax.block_until_ready(fwd_f32(x2))
    assert out2.shape == (10, X_dim)
    assert jnp.allclose(out2, ref2, atol=1e-5, rtol=1e-5)

    # Default bf16 MXU path (v6e/v7x-friendly): looser check (activations pass
    # through bf16 between the three matmuls; f32 accumulation + f32 epilogue).
    fwd_bf16 = make_generator_fc(params)
    out_bf16 = jax.block_until_ready(fwd_bf16(x))
    assert out_bf16.shape == (batch, X_dim)
    assert bool(jnp.all(jnp.isfinite(out_bf16)))
    assert float(jnp.max(jnp.abs(out_bf16 - ref))) < 0.1

    print("KERNEL_OK")
</pallas_src>

<mosaic_0001>
module attributes {stable_mosaic.version = 11 : i64} {
  func.func @_mlp_stats_kernel(%arg0: i32, %arg1: memref<8x128xf32, #tpu.memory_space<vmem>>, %arg2: memref<128x128xf32, #tpu.memory_space<vmem>>, %arg3: memref<128x128xf32, #tpu.memory_space<vmem>>, %arg4: memref<128x128xf32, #tpu.memory_space<vmem>>, %arg5: memref<2x128xf32, #tpu.memory_space<vmem>>, %arg6: memref<8x128xf32, #tpu.memory_space<vmem>>, %arg7: memref<1x2x128xf32, #tpu.memory_space<vmem>>) attributes {dimension_semantics = [#tpu.dimension_semantics<parallel>], iteration_bounds = array<i64: 1>, scalar_prefetch = 0 : i64, scratch_operands = 0 : i64, tpu.core_type = #tpu.core_type<tc>, window_params = [{transform_indices = @transform_0, window_bounds = array<i64: 8, 128>}, {pipeline_mode = #tpu.pipeline_mode<synchronous>, transform_indices = @transform_1, window_bounds = array<i64: 128, 128>}, {pipeline_mode = #tpu.pipeline_mode<synchronous>, transform_indices = @transform_2, window_bounds = array<i64: 128, 128>}, {pipeline_mode = #tpu.pipeline_mode<synchronous>, transform_indices = @transform_3, window_bounds = array<i64: 128, 128>}, {pipeline_mode = #tpu.pipeline_mode<synchronous>, transform_indices = @transform_4, window_bounds = array<i64: 2, 128>}, {transform_indices = @transform_5, window_bounds = array<i64: 8, 128>}, {transform_indices = @transform_6, window_bounds = array<i64: 1, 2, 128>}]} {
    %c0 = arith.constant 0 : index
    %c0_0 = arith.constant 0 : index
    %0 = vector.load %arg5[%c0, %c0_0] : memref<2x128xf32, #tpu.memory_space<vmem>>, vector<2x128xf32>
    %c0_1 = arith.constant 0 : index
    %c0_2 = arith.constant 0 : index
    %1 = vector.load %arg1[%c0_1, %c0_2] : memref<8x128xf32, #tpu.memory_space<vmem>>, vector<8x128xf32>
    %c0_3 = arith.constant 0 : index
    %c0_4 = arith.constant 0 : index
    %2 = vector.load %arg2[%c0_3, %c0_4] : memref<128x128xf32, #tpu.memory_space<vmem>>, vector<128x128xf32>
    %cst = arith.constant dense<0.000000e+00> : vector<8x128xf32>
    %3 = tpu.matmul %1, %2, %cst {dimension_numbers = #tpu.dot_dimension_numbers<[1], [0], [0], [1], [0, 0, 1, 1], [], []>} : vector<8x128xf32>, vector<128x128xf32>, vector<8x128xf32> -> vector<8x128xf32>
    %4 = vector.extract_strided_slice %0 {offsets = [0, 0], sizes = [1, 128], strides = [1, 1]} : vector<2x128xf32> to vector<1x128xf32>
    %5 = vector.broadcast %4 : vector<1x128xf32> to vector<8x128xf32>
    %6 = arith.addf %3, %5 : vector<8x128xf32>
    %cst_5 = arith.constant 0.000000e+00 : f32
    %7 = vector.broadcast %cst_5 : f32 to vector<8x128xf32>
    %8 = arith.maximumf %6, %7 : vector<8x128xf32>
    %c0_6 = arith.constant 0 : index
    %c0_7 = arith.constant 0 : index
    %9 = vector.load %arg3[%c0_6, %c0_7] : memref<128x128xf32, #tpu.memory_space<vmem>>, vector<128x128xf32>
    %cst_8 = arith.constant dense<0.000000e+00> : vector<8x128xf32>
    %10 = tpu.matmul %8, %9, %cst_8 {dimension_numbers = #tpu.dot_dimension_numbers<[1], [0], [0], [1], [0, 0, 1, 1], [], []>} : vector<8x128xf32>, vector<128x128xf32>, vector<8x128xf32> -> vector<8x128xf32>
    %11 = vector.extract_strided_slice %0 {offsets = [1, 0], sizes = [1, 128], strides = [1, 1]} : vector<2x128xf32> to vector<1x128xf32>
    %12 = vector.broadcast %11 : vector<1x128xf32> to vector<8x128xf32>
    %13 = arith.addf %10, %12 : vector<8x128xf32>
    %cst_9 = arith.constant 0.000000e+00 : f32
    %14 = vector.broadcast %cst_9 : f32 to vector<8x128xf32>
    %15 = arith.maximumf %13, %14 : vector<8x128xf32>
    %c0_10 = arith.constant 0 : index
    %c0_11 = arith.constant 0 : index
    %16 = vector.load %arg4[%c0_10, %c0_11] : memref<128x128xf32, #tpu.memory_space<vmem>>, vector<128x128xf32>
    %cst_12 = arith.constant dense<0.000000e+00> : vector<8x128xf32>
    %17 = tpu.matmul %15, %16, %cst_12 {dimension_numbers = #tpu.dot_dimension_numbers<[1], [0], [0], [1], [0, 0, 1, 1], [], []>} : vector<8x128xf32>, vector<128x128xf32>, vector<8x128xf32> -> vector<8x128xf32>
    %c0_13 = arith.constant 0 : index
    %c0_14 = arith.constant 0 : index
    %18 = vector.load %arg6[%c0_13, %c0_14] : memref<8x128xf32, #tpu.memory_space<vmem>>, vector<8x128xf32>
    tpu.vector_store %arg6[%c0_13, %c0_14], %17 {strides = array<i32>} : memref<8x128xf32, #tpu.memory_space<vmem>>, vector<8x128xf32>,
    %cst_15 = arith.constant dense<0.000000e+00> : vector<128xf32>
    %19 = vector.multi_reduction <add>, %17, %cst_15 [0] : vector<8x128xf32> to vector<128xf32>
    %20 = vector.shape_cast %19 : vector<128xf32> to vector<1x128xf32>
    %21 = arith.mulf %17, %17 : vector<8x128xf32>
    %cst_16 = arith.constant dense<0.000000e+00> : vector<128xf32>
    %22 = vector.multi_reduction <add>, %21, %cst_16 [0] : vector<8x128xf32> to vector<128xf32>
    %23 = vector.shape_cast %22 : vector<128xf32> to vector<1x128xf32>
    %24 = tpu.concatenate %20, %23 in 0 : vector<1x128xf32>, vector<1x128xf32> -> vector<2x128xf32>
    %c0_17 = arith.constant 0 : index
    %c0_18 = arith.constant 0 : index
    %c0_19 = arith.constant 0 : index
    %25 = vector.load %arg7[%c0_17, %c0_18, %c0_19] : memref<1x2x128xf32, #tpu.memory_space<vmem>>, vector<1x2x128xf32>
    %26 = vector.shape_cast %25 : vector<1x2x128xf32> to vector<2x128xf32>
    %27 = vector.shape_cast %24 : vector<2x128xf32> to vector<1x2x128xf32>
    tpu.vector_store %arg7[%c0_17, %c0_18, %c0_19], %27 {strides = array<i32>} : memref<1x2x128xf32, #tpu.memory_space<vmem>>, vector<1x2x128xf32>,
    return
  }
  func.func @transform_0(%arg0: i32) -> (i32, i32) {
    %c0_i32 = arith.constant 0 : i32
    %c0_i32_0 = arith.constant 0 : i32
    return %arg0, %c0_i32 : i32, i32
  }
  func.func @transform_1(%arg0: i32) -> (i32, i32) {
    %c0_i32 = arith.constant 0 : i32
    %c0_i32_0 = arith.constant 0 : i32
    %c0_i32_1 = arith.constant 0 : i32
    return %c0_i32, %c0_i32_0 : i32, i32
  }
  func.func @transform_2(%arg0: i32) -> (i32, i32) {
    %c0_i32 = arith.constant 0 : i32
    %c0_i32_0 = arith.constant 0 : i32
    %c0_i32_1 = arith.constant 0 : i32
    return %c0_i32, %c0_i32_0 : i32, i32
  }
  func.func @transform_3(%arg0: i32) -> (i32, i32) {
    %c0_i32 = arith.constant 0 : i32
    %c0_i32_0 = arith.constant 0 : i32
    %c0_i32_1 = arith.constant 0 : i32
    return %c0_i32, %c0_i32_0 : i32, i32
  }
  func.func @transform_4(%arg0: i32) -> (i32, i32) {
    %c0_i32 = arith.constant 0 : i32
    %c0_i32_0 = arith.constant 0 : i32
    %c0_i32_1 = arith.constant 0 : i32
    return %c0_i32, %c0_i32_0 : i32, i32
  }
  func.func @transform_5(%arg0: i32) -> (i32, i32) {
    %c0_i32 = arith.constant 0 : i32
    %c0_i32_0 = arith.constant 0 : i32
    return %arg0, %c0_i32 : i32, i32
  }
  func.func @transform_6(%arg0: i32) -> (i32, i32, i32) {
    %c0_i32 = arith.constant 0 : i32
    %c0_i32_0 = arith.constant 0 : i32
    %c0_i32_1 = arith.constant 0 : i32
    return %arg0, %c0_i32, %c0_i32_0 : i32, i32, i32
  }
}

module attributes {stable_mosaic.version = 11 : i64} {
  func.func @_bn_sigmoid_kernel(%arg0: i32, %arg1: memref<8x128xf32, #tpu.memory_space<vmem>>, %arg2: memref<2x128xf32, #tpu.memory_space<vmem>>, %arg3: memref<8x128xf32, #tpu.memory_space<vmem>>) attributes {dimension_semantics = [#tpu.dimension_semantics<parallel>], iteration_bounds = array<i64: 1>, scalar_prefetch = 0 : i64, scratch_operands = 0 : i64, tpu.core_type = #tpu.core_type<tc>, window_params = [{transform_indices = @transform_0, window_bounds = array<i64: 8, 128>}, {pipeline_mode = #tpu.pipeline_mode<synchronous>, transform_indices = @transform_1, window_bounds = array<i64: 2, 128>}, {transform_indices = @transform_2, window_bounds = array<i64: 8, 128>}]} {
    %c0 = arith.constant 0 : index
    %c0_0 = arith.constant 0 : index
    %0 = vector.load %arg2[%c0, %c0_0] : memref<2x128xf32, #tpu.memory_space<vmem>>, vector<2x128xf32>
    %c0_1 = arith.constant 0 : index
    %c0_2 = arith.constant 0 : index
    %1 = vector.load %arg1[%c0_1, %c0_2] : memref<8x128xf32, #tpu.memory_space<vmem>>, vector<8x128xf32>
    %2 = vector.extract_strided_slice %0 {offsets = [0, 0], sizes = [1, 128], strides = [1, 1]} : vector<2x128xf32> to vector<1x128xf32>
    %3 = vector.broadcast %2 : vector<1x128xf32> to vector<8x128xf32>
    %4 = arith.mulf %1, %3 : vector<8x128xf32>
    %5 = vector.extract_strided_slice %0 {offsets = [1, 0], sizes = [1, 128], strides = [1, 1]} : vector<2x128xf32> to vector<1x128xf32>
    %6 = vector.broadcast %5 : vector<1x128xf32> to vector<8x128xf32>
    %7 = arith.addf %4, %6 : vector<8x128xf32>
    %8 = math.tanh %7 : vector<8x128xf32>
    %cst = arith.constant 5.000000e-01 : f32
    %9 = vector.broadcast %cst : f32 to vector<8x128xf32>
    %10 = arith.mulf %9, %8 : vector<8x128xf32>
    %cst_3 = arith.constant 5.000000e-01 : f32
    %11 = vector.broadcast %cst_3 : f32 to vector<8x128xf32>
    %12 = arith.addf %10, %11 : vector<8x128xf32>
    %c0_4 = arith.constant 0 : index
    %c0_5 = arith.constant 0 : index
    %13 = vector.load %arg3[%c0_4, %c0_5] : memref<8x128xf32, #tpu.memory_space<vmem>>, vector<8x128xf32>
    tpu.vector_store %arg3[%c0_4, %c0_5], %12 {strides = array<i32>} : memref<8x128xf32, #tpu.memory_space<vmem>>, vector<8x128xf32>,
    return
  }
  func.func @transform_0(%arg0: i32) -> (i32, i32) {
    %c0_i32 = arith.constant 0 : i32
    %c0_i32_0 = arith.constant 0 : i32
    return %arg0, %c0_i32 : i32, i32
  }
  func.func @transform_1(%arg0: i32) -> (i32, i32) {
    %c0_i32 = arith.constant 0 : i32
    %c0_i32_0 = arith.constant 0 : i32
    %c0_i32_1 = arith.constant 0 : i32
    return %c0_i32, %c0_i32_0 : i32, i32
  }
  func.func @transform_2(%arg0: i32) -> (i32, i32) {
    %c0_i32 = arith.constant 0 : i32
    %c0_i32_0 = arith.constant 0 : i32
    return %arg0, %c0_i32 : i32, i32
  }
}

</mosaic_0001>

<bundles_post_ra>
// kernel: _generator_fc_impl.3
= control target key start
LH: loop header
LB: loop body
LE: loop exit
PB: predicated region body
PF: predicated region fallthrough
CT: control target
= control target key end

     0   :  { %v13_v0 = vlaneseq  ;;  %s57_s1 = inlined_call_operand.vmem [shape: f32[2,128], index: 1, kind: input, shape index: {}]   ;;  %s58_s0 = inlined_call_operand.vmem [shape: f32[8,128], index: 0, kind: input, shape index: {}, may-alias: {0,2}]   ;;  %s59_s2 = inlined_call_operand.vmem [shape: f32[8,128], index: 2, kind: output, shape index: {}, may-alias: {0,2}]  }
   0x1   :  { %v11_v2 = vld [vmem:[%s57_s1] sm:$0x3] }
   0x2   :  { %v14_v1 = vshrl.u32 %v13_v0, 7  ;;  %v12_v5 = vld [vmem:[%s58_s0] sm:$0xff] }
   0x4   :  { %v15_v3 = vsub.s32 0, %v14_v1  ;;  %v20_v4 = vsub.s32 1, %v14_v1 }
   0x6   :  { %v16_v6 = vrot.slane %v11_v2, %v15_v3  ;;  %v21_v7 = vrot.slane %v11_v2, %v20_v4 }
   0x8   :  { %v17_v8 = vmul.f32 %v16_v6, %v12_v5 }
   0xa   :  { %v22_v9 = vadd.f32 %v21_v7, %v17_v8 }
   0xc   :  { %31 = vtanh.f32 %v22_v9 }
  0x16   :  { %v32_v10 = vpop.eup %31 }
  0x17   :  { %v24_v11 = vmul.f32 0.5, %v32_v10 }
  0x19   :  { %v25_v12 = vadd.f32 0.5, %v24_v11 }
  0x1b   :  { %26 = vst [vmem:[%s59_s2] sm:$0xff] %v25_v12 }

// kernel: _generator_fc_impl.2
= control target key start
LH: loop header
LB: loop body
LE: loop exit
PB: predicated region body
PF: predicated region fallthrough
CT: control target
= control target key end

     0   :  { %12 = vsyncpa [#allocation3], 0  ;;  %s803_s0 = inlined_call_operand.vmem [shape: f32[8,128], index: 0, kind: input, shape index: {}]   ;;  %s804_s1 = inlined_call_operand.hbm [shape: f32[128,128], index: 1, kind: input, shape index: {}]   ;;  %s805_s2 = inlined_call_operand.hbm [shape: f32[128,128], index: 2, kind: input, shape index: {}]   ;;  %s806_s3 = inlined_call_operand.hbm [shape: f32[128,128], index: 3, kind: input, shape index: {}]   ;;  %s807_s4 = inlined_call_operand.vmem [shape: f32[2,128], index: 4, kind: input, shape index: {}]   ;;  %s808_s5 = inlined_call_operand.vmem [shape: f32[8,128], index: 5, kind: output, shape index: {0}]   ;;  %s809_s6 = inlined_call_operand.vmem [shape: f32[1,2,128], index: 6, kind: output, shape index: {1}]  }
   0x1   :  { %13 = vsyncpa [#allocation5], 0  ;;  %s666_s21 = smov [#allocation4]   ;;  %s667_s23 = smov [#allocation2]  }
   0x2   :  { %s33_s22 = sshll.u32 %s666_s21, 4  ;;  %s21_s24 = sshll.u32 %s667_s23, 4  ;;  %s34_s22 = int_to_ptr.vmem [resolvable:$true] %s33_s22  ;;  %s709_s24 = int_to_ptr.vmem [resolvable:$true] %s21_s24 }
   0x3   :  { %s596_s27 = scalar_lea.hbm %s805_s2, 2048 }
   0x4   :  { %p597_p0 = scmp.ne.s32.totalorder %s805_s2, %s596_s27  ;;  %p600_p1 = scmp.lt.u32.totalorder %s596_s27, %s805_s2 }
   0x6   :  { %p602_p2 = pnand %p600_p1, %p597_p0 }
   0x8   :  { %605 = shalt.err (!%p602_p2)
}
   0x9   :  { %s606_s8 = scalar_lea.vmem %s34_s22, 2048  ;;  %p611_p4 = scmp.lt.s32.totalorder %s34_s22, %s34_s22 }
   0xa   :  { %p607_p3 = scmp.ne.s32.totalorder %s34_s22, %s606_s8  ;;  %p612_p5 = scmp.lt.s32.totalorder %s606_s8, %s606_s8 }
   0xc   :  { %p613_p6 = por %p612_p5, %p611_p4 }
   0xe   :  { %p614_p7 = pnand %p613_p6, %p607_p3 }
  0x10   :  { %617 = shalt.err (!%p614_p7)
}
  0x11   :  { %s668_s9 = smov 128   ;;  %s669_s10 = smov 8  }
  0x12   :  { %39 = dma.hbm_to_vmem [thread:$0]  %s805_s2, 2048, %s34_s22, [#allocation5], %s668_s9, %s668_s9, %s669_s10  }
  0x13   :  { %s618_s15 = scalar_lea.hbm %s804_s1, 2048 }
  0x14   :  { %p619_p8 = scmp.ne.s32.totalorder %s804_s1, %s618_s15  ;;  %p622_p9 = scmp.lt.u32.totalorder %s618_s15, %s804_s1 }
  0x16   :  { %p624_p10 = pnand %p622_p9, %p619_p8 }
  0x18   :  { %627 = shalt.err (!%p624_p10)
}
  0x19   :  { %s628_s20 = scalar_lea.vmem %s709_s24, 2048  ;;  %p633_p12 = scmp.lt.s32.totalorder %s709_s24, %s709_s24 }
  0x1a   :  { %p629_p11 = scmp.ne.s32.totalorder %s709_s24, %s628_s20  ;;  %p634_p13 = scmp.lt.s32.totalorder %s628_s20, %s628_s20 }
  0x1c   :  { %p635_p0 = por %p634_p13, %p633_p12 }
  0x1e   :  { %p636_p1 = pnand %p635_p0, %p629_p11 }
  0x20   :  { %639 = shalt.err (!%p636_p1)
}
  0x21   :  { %27 = dma.hbm_to_vmem [thread:$0]  %s804_s1, 2048, %s709_s24, [#allocation3], %s668_s9, %s668_s9, %s669_s10  }
  0x22   :  { %s670_s22 = smov [#allocation6]   ;;  %s640_s27 = scalar_lea.hbm %s806_s3, 2048 }
  0x23   :  { %s45_s23 = sshll.u32 %s670_s22, 4  ;;  %p641_p2 = scmp.ne.s32.totalorder %s806_s3, %s640_s27  ;;  %s46_s23 = int_to_ptr.vmem [resolvable:$true] %s45_s23 }
  0x24   :  { %p644_p3 = scmp.lt.u32.totalorder %s640_s27, %s806_s3 }
  0x26   :  { %p646_p4 = pnand %p644_p3, %p641_p2 }
  0x28   :  { %649 = shalt.err (!%p646_p4)
}
  0x29   :  { %s650_s8 = scalar_lea.vmem %s46_s23, 2048  ;;  %p655_p6 = scmp.lt.s32.totalorder %s46_s23, %s46_s23 }
  0x2a   :  { %p651_p5 = scmp.ne.s32.totalorder %s46_s23, %s650_s8  ;;  %p656_p7 = scmp.lt.s32.totalorder %s650_s8, %s650_s8 }
  0x2c   :  { %p657_p8 = por %p656_p7, %p655_p6 }
  0x2e   :  { %p658_p9 = pnand %p657_p8, %p651_p5 }
  0x30   :  { %661 = shalt.err (!%p658_p9)
}
  0x31   :  { %51 = dma.hbm_to_vmem [thread:$0]  %s806_s3, 2048, %s46_s23, [#allocation5], %s668_s9, %s668_s9, %s669_s10  }
  0x32   :  { %662 = dma.done.wait [#allocation3], 2048  }
  0x33   :  { %663 = vsyncadd [#allocation3], 4294965248 }
  0x34   :  { %664 = dma.done.wait [#allocation5], 4096  }
  0x35   :  { %665 = vsyncadd [#allocation5], 4294963200  ;;  %v671_v0 = vmov 0.0|0.0   ;;  %vm672_vm0 = vmmov 0   ;;  %v673_v1 = vmov 0.0   ;;  %v65_v2 = vld [vmem:[#allocation2] sm:$0xff] }
  0x36   :  { %516 = vmatprep.subr.bf16.mxu0 %v671_v0  ;;  %443 = vmatprep.mubr.msk.f32.mxu0 %vm672_vm0, %v673_v1  ;;  %v66_v3 = vld [vmem:[#allocation2 + $0x8] sm:$0xff]  ;;  %v67_v4 = vld [vmem:[#allocation2 + $0x10] sm:$0xff]  ;;  %v68_v6 = vld [vmem:[#allocation2 + $0x18] sm:$0xff]  ;;  %vm347_vm1 = vcmask 1040384  }
  0x37   :  { %540 = vmatprep.subr.bf16.mxu1 %v671_v0  ;;  %478 = vmatprep.mubr.msk.f32.mxu1 %vm672_vm0, %v673_v1  ;;  %v517_v5 = vpack.c.bf16 %v66_v3, %v65_v2  ;;  %v520_v7 = vpack.c.bf16 %v68_v6, %v67_v4  ;;  %v69_v8 = vld [vmem:[#allocation2 + $0x20] sm:$0xff]  ;;  %v70_v9 = vld [vmem:[#allocation2 + $0x28] sm:$0xff]  ;;  %v158_v12 = vld [vmem:[#allocation4 + $0x10] sm:$0xff] }
  0x38   :  { %v156_v10 = vld [vmem:[#allocation4] sm:$0xff]  ;;  %v157_v11 = vld [vmem:[#allocation4 + $0x8] sm:$0xff]  ;;  %v159_v13 = vld [vmem:[#allocation4 + $0x18] sm:$0xff]  ;;  %v523_v14 = vpack.c.bf16 %v70_v9, %v69_v8  ;;  %v81_v9 = vlaneseq }
  0x39   :  { %518 = vmatpush3.bf16.msra.mxu0 %v517_v5  ;;  %v541_v15 = vpack.c.bf16 %v157_v11, %v156_v10  ;;  %v71_v16 = vld [vmem:[#allocation2 + $0x30] sm:$0xff]  ;;  %v72_v17 = vld [vmem:[#allocation2 + $0x38] sm:$0xff]  ;;  %v544_v18 = vpack.c.bf16 %v159_v13, %v158_v12  ;;  %v160_v19 = vld [vmem:[#allocation4 + $0x20] sm:$0xff] }
  0x3a   :  { %519 = vmatprep.subr.bf16.mxu0 %v671_v0  ;;  %v161_v20 = vld [vmem:[#allocation4 + $0x28] sm:$0xff]  ;;  %v526_v21 = vpack.c.bf16 %v72_v17, %v71_v16  ;;  %v73_v22 = vld [vmem:[#allocation2 + $0x40] sm:$0xff]  ;;  %v162_v25 = vld [vmem:[#allocation4 + $0x30] sm:$0xff]  ;;  %v82_v10 = vshrl.u32 %v81_v9, 7 }
  0x3b   :  { %542 = vmatpush3.bf16.msra.mxu1 %v541_v15  ;;  %v74_v23 = vld [vmem:[#allocation2 + $0x48] sm:$0xff]  ;;  %v547_v24 = vpack.c.bf16 %v161_v20, %v160_v19  ;;  %v163_v26 = vld [vmem:[#allocation4 + $0x38] sm:$0xff]  ;;  %v75_v28 = vld [vmem:[#allocation2 + $0x50] sm:$0xff] }
  0x3c   :  { %543 = vmatprep.subr.bf16.mxu1 %v671_v0  ;;  %v529_v27 = vpack.c.bf16 %v74_v23, %v73_v22  ;;  %v76_v29 = vld [vmem:[#allocation2 + $0x58] sm:$0xff]  ;;  %v550_v30 = vpack.c.bf16 %v163_v26, %v162_v25  ;;  %v164_v31 = vld [vmem:[#allocation4 + $0x40] sm:$0xff]  ;;  %v165_v32 = vld [vmem:[#allocation4 + $0x48] sm:$0xff]  ;;  %v83_v11 = vsub.s32 0, %v82_v10 }
  0x3d   :  { %521 = vmatpush3.bf16.msra.mxu0 %v520_v7  ;;  %v532_v33 = vpack.c.bf16 %v76_v29, %v75_v28  ;;  %v77_v34 = vld [vmem:[#allocation2 + $0x60] sm:$0xff]  ;;  %v78_v35 = vld [vmem:[#allocation2 + $0x68] sm:$0xff]  ;;  %v553_v36 = vpack.c.bf16 %v165_v32, %v164_v31  ;;  %v166_v37 = vld [vmem:[#allocation4 + $0x50] sm:$0xff] }
  0x3e   :  { %522 = vmatprep.subr.bf16.mxu0 %v671_v0  ;;  %v167_v38 = vld [vmem:[#allocation4 + $0x58] sm:$0xff]  ;;  %v535_v39 = vpack.c.bf16 %v78_v35, %v77_v34  ;;  %v79_v40 = vld [vmem:[#allocation2 + $0x70] sm:$0xff]  ;;  %v168_v43 = vld [vmem:[#allocation4 + $0x60] sm:$0xff] }
  0x3f   :  { %545 = vmatpush3.bf16.msra.mxu1 %v544_v18  ;;  %v80_v41 = vld [vmem:[#allocation2 + $0x78] sm:$0xff]  ;;  %v556_v42 = vpack.c.bf16 %v167_v38, %v166_v37  ;;  %v169_v44 = vld [vmem:[#allocation4 + $0x68] sm:$0xff]  ;;  %v64_v47 = vld [vmem:[%s803_s0] sm:$0xff] }
  0x40   :  { %546 = vmatprep.subr.bf16.mxu1 %v671_v0  ;;  %v538_v45 = vpack.c.bf16 %v80_v41, %v79_v40  ;;  %v559_v46 = vpack.c.bf16 %v169_v44, %v168_v43  ;;  %v170_v48 = vld [vmem:[#allocation4 + $0x70] sm:$0xff]  ;;  %v171_v49 = vld [vmem:[#allocation4 + $0x78] sm:$0xff]  ;;  %v247_v51 = vld [vmem:[#allocation6] sm:$0xff] }
  0x41   :  { %524 = vmatpush3.bf16.msra.mxu0 %v523_v14  ;;  %v562_v50 = vpack.c.bf16 %v171_v49, %v170_v48  ;;  %v248_v52 = vld [vmem:[#allocation6 + $0x8] sm:$0xff]  ;;  %v249_v53 = vld [vmem:[#allocation6 + $0x10] sm:$0xff]  ;;  %v250_v55 = vld [vmem:[#allocation6 + $0x18] sm:$0xff] }
  0x42   :  { %525 = vmatprep.subr.bf16.mxu0 %v671_v0  ;;  %v565_v54 = vpack.c.bf16 %v248_v52, %v247_v51  ;;  %v568_v56 = vpack.c.bf16 %v250_v55, %v249_v53  ;;  %v251_v57 = vld [vmem:[#allocation6 + $0x20] sm:$0xff]  ;;  %v252_v58 = vld [vmem:[#allocation6 + $0x28] sm:$0xff]  ;;  %v253_v60 = vld [vmem:[#allocation6 + $0x30] sm:$0xff] }
  0x43   :  { %548 = vmatpush3.bf16.msra.mxu1 %v547_v24  ;;  %v571_v59 = vpack.c.bf16 %v252_v58, %v251_v57  ;;  %v254_v61 = vld [vmem:[#allocation6 + $0x38] sm:$0xff]  ;;  %v255_v63 = vld [vmem:[#allocation6 + $0x40] sm:$0xff]  ;;  %v257_v3 = vld [vmem:[#allocation6 + $0x50] sm:$0xff] }
  0x44   :  { %549 = vmatprep.subr.bf16.mxu1 %v671_v0  ;;  %v574_v62 = vpack.c.bf16 %v254_v61, %v253_v60  ;;  %v258_v4 = vld [vmem:[#allocation6 + $0x58] sm:$0xff]  ;;  %v259_v6 = vld [vmem:[#allocation6 + $0x60] sm:$0xff]  ;;  %v260_v7 = vld [vmem:[#allocation6 + $0x68] sm:$0xff] }
  0x45   :  { %527 = vmatpush3.bf16.msra.mxu0 %v526_v21  ;;  %v580_v5 = vpack.c.bf16 %v258_v4, %v257_v3  ;;  %v583_v8 = vpack.c.bf16 %v260_v7, %v259_v6  ;;  %v63_v12 = vld [vmem:[%s807_s4] sm:$0x3]  ;;  %v261_v18 = vld [vmem:[#allocation6 + $0x70] sm:$0xff]  ;;  %v262_v19 = vld [vmem:[#allocation6 + $0x78] sm:$0xff]  ;;  %v174_v21 = vsub.s32 1, %v82_v10 }
  0x46   :  { %528 = vmatprep.subr.bf16.mxu0 %v671_v0  ;;  %v84_v13 = vrot.slane %v63_v12, %v83_v11  ;;  %v586_v20 = vpack.c.bf16 %v262_v19, %v261_v18 }
  0x47   :  { %551 = vmatpush3.bf16.msra.mxu1 %v550_v30  ;;  %v175_v22 = vrot.slane %v63_v12, %v174_v21 }
  0x48   :  { %552 = vmatprep.subr.bf16.mxu1 %v671_v0 }
  0x49   :  { %530 = vmatpush3.bf16.msra.mxu0 %v529_v27 }
  0x4a   :  { %531 = vmatprep.subr.bf16.mxu0 %v671_v0 }
  0x4b   :  { %554 = vmatpush3.bf16.msra.mxu1 %v553_v36 }
  0x4c   :  { %555 = vmatprep.subr.bf16.mxu1 %v671_v0 }
  0x4d   :  { %533 = vmatpush3.bf16.msra.mxu0 %v532_v33 }
  0x4e   :  { %534 = vmatprep.subr.bf16.mxu0 %v671_v0 }
  0x4f   :  { %557 = vmatpush3.bf16.msra.mxu1 %v556_v42 }
  0x50   :  { %558 = vmatprep.subr.bf16.mxu1 %v671_v0 }
  0x51   :  { %536 = vmatpush3.bf16.msra.mxu0 %v535_v39 }
  0x52   :  { %537 = vmatprep.subr.bf16.mxu0 %v671_v0 }
  0x53   :  { %560 = vmatpush3.bf16.msra.mxu1 %v559_v46 }
  0x54   :  { %561 = vmatprep.subr.bf16.mxu1 %v671_v0 }
  0x55   :  { %539 = vmatpush3.bf16.msra.mxu0 %v538_v45 }
  0x56   :  { %564 = vmatprep.subr.bf16.mxu0 %v671_v0 }
  0x57   :  { %563 = vmatpush3.bf16.msra.mxu1 %v562_v50 }
  0x58   :  { %444 = vmatmul.mubr.f32.vlgmr.msra.gmra.mrb[0].mxu0 %v64_v47 }
  0x59   :  { %513 = vmatprep.mubr.msk.f32.mxu0 %vm672_vm0, %v673_v1  ;;  %566 = vmatpush3.bf16.msra.mxu0 %v565_v54  ;;  %v256_v1 = vld [vmem:[#allocation6 + $0x48] sm:$0xff] }
  0x5a   :  { %567 = vmatprep.subr.bf16.mxu0 %v671_v0  ;;  %v577_v2 = vpack.c.bf16 %v256_v1, %v255_v63 }
  0x5d   :  { %569 = vmatpush3.bf16.msra.mxu0 %v568_v56 }
  0x5e   :  { %570 = vmatprep.subr.bf16.mxu0 %v671_v0 }
  0x61   :  { %572 = vmatpush3.bf16.msra.mxu0 %v571_v59 }
  0x62   :  { %573 = vmatprep.subr.bf16.mxu0 %v671_v0 }
  0x65   :  { %575 = vmatpush3.bf16.msra.mxu0 %v574_v62 }
  0x66   :  { %576 = vmatprep.subr.bf16.mxu0 %v671_v0 }
  0x69   :  { %578 = vmatpush3.bf16.msra.mxu0 %v577_v2 }
  0x6a   :  { %579 = vmatprep.subr.bf16.mxu0 %v671_v0 }
  0x6d   :  { %581 = vmatpush3.bf16.msra.mxu0 %v580_v5 }
  0x6e   :  { %582 = vmatprep.subr.bf16.mxu0 %v671_v0 }
  0x71   :  { %584 = vmatpush3.bf16.msra.mxu0 %v583_v8 }
  0x72   :  { %585 = vmatprep.subr.bf16.mxu0 %v671_v0 }
  0x75   :  { %587 = vmatpush3.bf16.msra.mxu0 %v586_v20 }
 0x12b   :  { %v151_v14 = vpop.f32.mrb[0].mxu0 }
 0x12c   :  { %v152_v15 = vadd.f32 %v151_v14, %v84_v13  ;;  %v445_v16 = vpop.f32.mrb[1].mxu0 }
 0x12e   :  { %v155_v17 = vmax.f32 %v152_v15, 0.0 }
 0x130   :  { %479 = vmatmul.mubr.f32.vlgmr.msra.gmra.mrb[0].mxu1 %v155_v17 }
 0x203   :  { %v242_v0 = vpop.f32.mrb[0].mxu1 }
 0x204   :  { %v243_v23 = vadd.f32 %v242_v0, %v175_v22  ;;  %v480_v24 = vpop.f32.mrb[1].mxu1 }
 0x206   :  { %v246_v25 = vmax.f32 %v243_v23, 0.0 }
 0x208   :  { %514 = vmatmul.mubr.f32.vlgmr.msra.gmra.mrb[2].mxu0 %v246_v25 }
 0x2db   :  { %v329_v26 = vpop.f32.mrb[2].mxu0 }
 0x2dc   :  { %333 = vst [vmem:[%s808_s5] sm:$0xff] %v329_v26  ;;  %v334_v27 = vrot.slane %v329_v26, 4  ;;  %v340_v28 = vmul.f32 %v329_v26, %v329_v26  ;;  %v515_v29 = vpop.f32.mrb[3].mxu0 }
 0x2de   :  { %v335_v30 = vadd.f32 %v334_v27, %v329_v26  ;;  %v341_v31 = vrot.slane %v340_v28, 4 }
 0x2e0   :  { %v336_v32 = vrot.slane %v335_v30, 2  ;;  %v342_v33 = vadd.f32 %v341_v31, %v340_v28 }
 0x2e2   :  { %v337_v34 = vadd.f32 %v336_v32, %v335_v30  ;;  %v343_v35 = vrot.slane %v342_v33, 2 }
 0x2e4   :  { %v338_v36 = vrot.slane %v337_v34, 1  ;;  %v344_v37 = vadd.f32 %v343_v35, %v342_v33 }
 0x2e6   :  { %v345_v38 = vrot.slane %v344_v37, 1  ;;  %v339_v39 = vadd.f32 %v338_v36, %v337_v34 }
 0x2e8   :  { %v346_v40 = vadd.f32 %v345_v38, %v344_v37 }
 0x2ea   :  { %v348_v41 = vsel %vm347_vm1, %v339_v39, %v346_v40 }
 0x2eb   :  { %349 = vst [vmem:[%s809_s6] sm:$0x3] %v348_v41 }
 0x2ec   :  { %358 = vsyncpa [#allocation3], 1 }
 0x2ed   :  { %359 = vsyncpa [#allocation5], 1 }

</bundles_post_ra>
